<compile_context>
chip_gen: v6e
topology: v6e:2x2x1
jax: 0.10.0
libtpu: 0.0.40
codegen_flags: <defaults>
</compile_context>

<pallas_src>
import functools

import jax
import jax.numpy as jnp
from jax.experimental import pallas as pl
from jax.experimental.pallas import tpu as pltpu

MARGIN = 2.0          # BCL(margin=2.0)
SMOOTH = 1e-5         # dice smooth
EPS = 1e-4            # pos_num / neg_num epsilon
LANES = 128           # lane-dense last dim
MAX_TILE_ROWS = 1024  # 1024*128 f32 = 512 KiB per input per pipeline buffer


def _bdcl_kernel(n_valid, n_padded, tile_rows,
                 dist_ref, label_ref, bcl_ref, dice_ref,
                 s1_acc, s2_acc, pos_acc, neg_acc, i_acc, j_acc, x_acc):
    """Grid step: elementwise transform + 7 partial sums into VMEM accumulators."""
    pid = pl.program_id(0)

    @pl.when(pid == 0)
    def _init():
        for acc in (s1_acc, s2_acc, pos_acc, neg_acc, i_acc, j_acc, x_acc):
            acc[...] = jnp.zeros_like(acc)

    d = dist_ref[...]
    lab = label_ref[...]

    # In-place relabel from BCL.forward: 1 -> -1, then 0 -> 1, everything else kept.
    lab_m = jnp.where(lab == 1.0, -1.0, jnp.where(lab == 0.0, 1.0, lab))

    mask255 = (lab_m != 255.0).astype(jnp.float32)
    dm = d * mask255                                  # distance used inside BCL only
    clamp = jnp.maximum(MARGIN - dm, 0.0)

    pos = (lab_m == 1.0).astype(jnp.float32)
    neg = (lab_m == -1.0).astype(jnp.float32)

    # Exact PyTorch formulas (255 pixels DO contribute to loss_2 and dice).
    s1_e = (1.0 + lab_m) * 0.5 * dm * dm
    s2_e = (1.0 - lab_m) * 0.5 * clamp * clamp
    i_e = d                                           # dice: y_true   (orig distance)
    j_e = lab_m                                       # dice: y_pred   (mutated label)
    x_e = d * lab_m                                   # dice: y_true * y_pred

    if n_valid < n_padded:
        # Only emitted when padding exists. Padded elements (d=0, lab=0) are
        # NOT neutral (lab=0 -> +1 label), so they must be masked out.
        tile_elems = tile_rows * LANES
        r = jax.lax.broadcasted_iota(jnp.int32, d.shape, 0)
        c = jax.lax.broadcasted_iota(jnp.int32, d.shape, 1)
        g = pid * tile_elems + r * LANES + c
        vf = (g < n_valid).astype(jnp.float32)
        pos, neg = pos * vf, neg * vf
        s1_e, s2_e = s1_e * vf, s2_e * vf
        i_e, j_e, x_e = i_e * vf, j_e * vf, x_e * vf

    s1_acc[...] += jnp.sum(s1_e, keepdims=True)       # (1, 1) partial sums
    s2_acc[...] += jnp.sum(s2_e, keepdims=True)
    pos_acc[...] += jnp.sum(pos, keepdims=True)
    neg_acc[...] += jnp.sum(neg, keepdims=True)
    i_acc[...] += jnp.sum(i_e, keepdims=True)
    j_acc[...] += jnp.sum(j_e, keepdims=True)
    x_acc[...] += jnp.sum(x_e, keepdims=True)

    @pl.when(pid == pl.num_programs(0) - 1)
    def _finalize():
        pos_num = pos_acc[...] + EPS
        neg_num = neg_acc[...] + EPS
        bcl_ref[...] = s1_acc[...] / pos_num + s2_acc[...] / neg_num
        denom = i_acc[...] + j_acc[...] + SMOOTH
        score = (2.0 * x_acc[...] + SMOOTH) / denom
        dice_ref[...] = 1.0 - score


def bdcl_loss(distance, label, alpha, *, max_tile_rows=MAX_TILE_ROWS):
    """Pallas-backed BDCL forward. Returns a scalar float32 loss."""
    total = int(distance.size)
    d_flat = jnp.ravel(distance).astype(jnp.float32)
    l_flat = jnp.ravel(label).astype(jnp.float32)

    rows = (total + LANES - 1) // LANES
    if rows <= max_tile_rows:
        tile_rows = rows                              # single-tile grid
    else:
        tile_rows = max_tile_rows
        assert tile_rows % 8 == 0, "tiled row count must be a multiple of 8"
    rows_padded = ((rows + tile_rows - 1) // tile_rows) * tile_rows
    n_padded = rows_padded * LANES

    if n_padded != total:
        pad = n_padded - total
        d_flat = jnp.pad(d_flat, (0, pad))
        l_flat = jnp.pad(l_flat, (0, pad))
    d2 = d_flat.reshape(rows_padded, LANES)           # lane-dense layout
    l2 = l_flat.reshape(rows_padded, LANES)
    num_tiles = rows_padded // tile_rows

    kernel = functools.partial(_bdcl_kernel, total, n_padded, tile_rows)
    bcl, dice = pl.pallas_call(
        kernel,
        out_shape=(jax.ShapeDtypeStruct((1, 1), jnp.float32),
                   jax.ShapeDtypeStruct((1, 1), jnp.float32)),
        grid_spec=pltpu.PrefetchScalarGridSpec(
            num_scalar_prefetch=0,
            grid=(num_tiles,),
            in_specs=[
                pl.BlockSpec((tile_rows, LANES), lambda i: (i, 0)),   # distance
                pl.BlockSpec((tile_rows, LANES), lambda i: (i, 0)),   # label
            ],
            out_specs=[
                pl.BlockSpec((1, 1), lambda i: (0, 0)),               # loss_BCL
                pl.BlockSpec((1, 1), lambda i: (0, 0)),               # loss_Dice
            ],
            scratch_shapes=[pltpu.VMEM((1, 1), jnp.float32)] * 7,
        ),
        compiler_params=pltpu.CompilerParams(
            dimension_semantics=("arbitrary",)),       # grid axis is a reduction
    )(d2, l2)

    alpha = jnp.float32(alpha)
    return (1.0 - alpha) * bcl[0, 0] + alpha * dice[0, 0]


def bdcl_ref(distance, label, alpha):
    """Pure-JAX reference mirroring the PyTorch forward (incl. label mutation)."""
    d = distance.astype(jnp.float32)
    lab = label.astype(jnp.float32)
    lab_m = jnp.where(lab == 1.0, -1.0, jnp.where(lab == 0.0, 1.0, lab))
    mask = (lab_m != 255.0).astype(jnp.float32)
    dm = d * mask
    pos_num = jnp.sum((lab_m == 1.0).astype(jnp.float32)) + EPS
    neg_num = jnp.sum((lab_m == -1.0).astype(jnp.float32)) + EPS
    loss1 = jnp.sum((1.0 + lab_m) / 2.0 * dm * dm) / pos_num
    loss2 = jnp.sum((1.0 - lab_m) / 2.0 * jnp.maximum(MARGIN - dm, 0.0) ** 2) / neg_num
    loss_bcl = loss1 + loss2
    i = jnp.sum(d)
    j = jnp.sum(lab_m)
    inter = jnp.sum(d * lab_m)
    loss_dice = 1.0 - (2.0 * inter + SMOOTH) / (i + j + SMOOTH)
    return (1.0 - alpha) * loss_bcl + alpha * loss_dice


def _make_inputs(key, shape):
    kd, kl = jax.random.split(key)
    distance = jax.random.uniform(kd, shape, jnp.float32) * 2.0
    # labels in {0 (no-change), 1 (change), 255 (ignore)}
    raw = jax.random.randint(kl, shape, 0, 3)
    label = jnp.where(raw == 2, 255, raw).astype(jnp.float32)
    return distance, label


if __name__ == "__main__":
    alpha = 0.5

    # Case 1: small NCHW, exact multiple of 128 -> no mask path, single-tile grid.
    distance, label = _make_inputs(jax.random.PRNGKey(0), (2, 1, 16, 16))
    loss = bdcl_loss(distance, label, alpha)
    jax.block_until_ready(loss)
    ref = bdcl_ref(distance, label, alpha)
    assert jnp.allclose(loss, ref, rtol=1e-3, atol=1e-4), (loss, ref)

    # Case 2: odd spatial size -> lane padding + iota mask path.
    d2, l2 = _make_inputs(jax.random.PRNGKey(1), (2, 1, 15, 15))
    loss2 = bdcl_loss(d2, l2, alpha)
    jax.block_until_ready(loss2)
    ref2 = bdcl_ref(d2, l2, alpha)
    assert jnp.allclose(loss2, ref2, rtol=1e-3, atol=1e-4), (loss2, ref2)

    # Case 3: forced small tile -> multi-step grid exercising the accumulators.
    d3, l3 = _make_inputs(jax.random.PRNGKey(2), (2, 1, 32, 32))
    loss3 = bdcl_loss(d3, l3, alpha, max_tile_rows=8)
    jax.block_until_ready(loss3)
    ref3 = bdcl_ref(d3, l3, alpha)
    assert jnp.allclose(loss3, ref3, rtol=1e-3, atol=1e-4), (loss3, ref3)

    print("KERNEL_OK")
</pallas_src>

<mosaic_0001>
module attributes {stable_mosaic.version = 11 : i64} {
  func.func @_bdcl_kernel(%arg0: i32, %arg1: memref<4x128xf32, #tpu.memory_space<vmem>>, %arg2: memref<4x128xf32, #tpu.memory_space<vmem>>, %arg3: memref<1x1xf32, #tpu.memory_space<vmem>>, %arg4: memref<1x1xf32, #tpu.memory_space<vmem>>, %arg5: memref<1x1xf32, #tpu.memory_space<vmem>>, %arg6: memref<1x1xf32, #tpu.memory_space<vmem>>, %arg7: memref<1x1xf32, #tpu.memory_space<vmem>>, %arg8: memref<1x1xf32, #tpu.memory_space<vmem>>, %arg9: memref<1x1xf32, #tpu.memory_space<vmem>>, %arg10: memref<1x1xf32, #tpu.memory_space<vmem>>, %arg11: memref<1x1xf32, #tpu.memory_space<vmem>>) attributes {dimension_semantics = [#tpu.dimension_semantics<arbitrary>], iteration_bounds = array<i64: 1>, scalar_prefetch = 0 : i64, scratch_operands = 7 : i64, tpu.core_type = #tpu.core_type<tc>, window_params = [{transform_indices = @transform_0, window_bounds = array<i64: 4, 128>}, {transform_indices = @transform_1, window_bounds = array<i64: 4, 128>}, {pipeline_mode = #tpu.pipeline_mode<synchronous>, transform_indices = @transform_2, window_bounds = array<i64: 1, 1>}, {pipeline_mode = #tpu.pipeline_mode<synchronous>, transform_indices = @transform_3, window_bounds = array<i64: 1, 1>}]} {
    %c0_i32 = arith.constant 0 : i32
    %0 = arith.cmpi eq, %arg0, %c0_i32 : i32
    %1 = arith.extui %0 : i1 to i32
    %c0_i32_0 = arith.constant 0 : i32
    %2 = arith.cmpi ne, %1, %c0_i32_0 : i32
    scf.if %2 {
      %cst_53 = arith.constant 0.000000e+00 : f32
      %102 = vector.broadcast %cst_53 : f32 to vector<1x1xf32>
      %c0_54 = arith.constant 0 : index
      %c0_55 = arith.constant 0 : index
      %103 = vector.load %arg5[%c0_54, %c0_55] : memref<1x1xf32, #tpu.memory_space<vmem>>, vector<1x1xf32>
      tpu.vector_store %arg5[%c0_54, %c0_55], %102 {strides = array<i32>} : memref<1x1xf32, #tpu.memory_space<vmem>>, vector<1x1xf32>,
      %cst_56 = arith.constant 0.000000e+00 : f32
      %104 = vector.broadcast %cst_56 : f32 to vector<1x1xf32>
      %c0_57 = arith.constant 0 : index
      %c0_58 = arith.constant 0 : index
      %105 = vector.load %arg6[%c0_57, %c0_58] : memref<1x1xf32, #tpu.memory_space<vmem>>, vector<1x1xf32>
      tpu.vector_store %arg6[%c0_57, %c0_58], %104 {strides = array<i32>} : memref<1x1xf32, #tpu.memory_space<vmem>>, vector<1x1xf32>,
      %cst_59 = arith.constant 0.000000e+00 : f32
      %106 = vector.broadcast %cst_59 : f32 to vector<1x1xf32>
      %c0_60 = arith.constant 0 : index
      %c0_61 = arith.constant 0 : index
      %107 = vector.load %arg7[%c0_60, %c0_61] : memref<1x1xf32, #tpu.memory_space<vmem>>, vector<1x1xf32>
      tpu.vector_store %arg7[%c0_60, %c0_61], %106 {strides = array<i32>} : memref<1x1xf32, #tpu.memory_space<vmem>>, vector<1x1xf32>,
      %cst_62 = arith.constant 0.000000e+00 : f32
      %108 = vector.broadcast %cst_62 : f32 to vector<1x1xf32>
      %c0_63 = arith.constant 0 : index
      %c0_64 = arith.constant 0 : index
      %109 = vector.load %arg8[%c0_63, %c0_64] : memref<1x1xf32, #tpu.memory_space<vmem>>, vector<1x1xf32>
      tpu.vector_store %arg8[%c0_63, %c0_64], %108 {strides = array<i32>} : memref<1x1xf32, #tpu.memory_space<vmem>>, vector<1x1xf32>,
      %cst_65 = arith.constant 0.000000e+00 : f32
      %110 = vector.broadcast %cst_65 : f32 to vector<1x1xf32>
      %c0_66 = arith.constant 0 : index
      %c0_67 = arith.constant 0 : index
      %111 = vector.load %arg9[%c0_66, %c0_67] : memref<1x1xf32, #tpu.memory_space<vmem>>, vector<1x1xf32>
      tpu.vector_store %arg9[%c0_66, %c0_67], %110 {strides = array<i32>} : memref<1x1xf32, #tpu.memory_space<vmem>>, vector<1x1xf32>,
      %cst_68 = arith.constant 0.000000e+00 : f32
      %112 = vector.broadcast %cst_68 : f32 to vector<1x1xf32>
      %c0_69 = arith.constant 0 : index
      %c0_70 = arith.constant 0 : index
      %113 = vector.load %arg10[%c0_69, %c0_70] : memref<1x1xf32, #tpu.memory_space<vmem>>, vector<1x1xf32>
      tpu.vector_store %arg10[%c0_69, %c0_70], %112 {strides = array<i32>} : memref<1x1xf32, #tpu.memory_space<vmem>>, vector<1x1xf32>,
      %cst_71 = arith.constant 0.000000e+00 : f32
      %114 = vector.broadcast %cst_71 : f32 to vector<1x1xf32>
      %c0_72 = arith.constant 0 : index
      %c0_73 = arith.constant 0 : index
      %115 = vector.load %arg11[%c0_72, %c0_73] : memref<1x1xf32, #tpu.memory_space<vmem>>, vector<1x1xf32>
      tpu.vector_store %arg11[%c0_72, %c0_73], %114 {strides = array<i32>} : memref<1x1xf32, #tpu.memory_space<vmem>>, vector<1x1xf32>,
    } else {
    }
    %c0 = arith.constant 0 : index
    %c0_1 = arith.constant 0 : index
    %3 = vector.load %arg1[%c0, %c0_1] : memref<4x128xf32, #tpu.memory_space<vmem>>, vector<4x128xf32>
    %c0_2 = arith.constant 0 : index
    %c0_3 = arith.constant 0 : index
    %4 = vector.load %arg2[%c0_2, %c0_3] : memref<4x128xf32, #tpu.memory_space<vmem>>, vector<4x128xf32>
    %cst = arith.constant 1.000000e+00 : f32
    %5 = vector.broadcast %cst : f32 to vector<4x128xf32>
    %6 = arith.cmpf oeq, %4, %5 : vector<4x128xf32>
    %cst_4 = arith.constant 0.000000e+00 : f32
    %7 = vector.broadcast %cst_4 : f32 to vector<4x128xf32>
    %8 = arith.cmpf oeq, %4, %7 : vector<4x128xf32>
    %cst_5 = arith.constant 1.000000e+00 : f32
    %9 = vector.broadcast %cst_5 : f32 to vector<4x128xf32>
    %10 = arith.select %8, %9, %4 : vector<4x128xi1>, vector<4x128xf32>
    %cst_6 = arith.constant -1.000000e+00 : f32
    %11 = vector.broadcast %cst_6 : f32 to vector<4x128xf32>
    %12 = arith.select %6, %11, %10 : vector<4x128xi1>, vector<4x128xf32>
    %cst_7 = arith.constant 2.550000e+02 : f32
    %13 = vector.broadcast %cst_7 : f32 to vector<4x128xf32>
    %14 = arith.cmpf one, %12, %13 : vector<4x128xf32>
    %15 = arith.extui %14 : vector<4x128xi1> to vector<4x128xi32>
    %16 = arith.sitofp %15 : vector<4x128xi32> to vector<4x128xf32>
    %17 = arith.mulf %3, %16 : vector<4x128xf32>
    %cst_8 = arith.constant 2.000000e+00 : f32
    %18 = vector.broadcast %cst_8 : f32 to vector<4x128xf32>
    %19 = arith.subf %18, %17 : vector<4x128xf32>
    %cst_9 = arith.constant 0.000000e+00 : f32
    %20 = vector.broadcast %cst_9 : f32 to vector<4x128xf32>
    %21 = arith.maximumf %19, %20 : vector<4x128xf32>
    %cst_10 = arith.constant 1.000000e+00 : f32
    %22 = vector.broadcast %cst_10 : f32 to vector<4x128xf32>
    %23 = arith.cmpf oeq, %12, %22 : vector<4x128xf32>
    %24 = arith.extui %23 : vector<4x128xi1> to vector<4x128xi32>
    %25 = arith.sitofp %24 : vector<4x128xi32> to vector<4x128xf32>
    %cst_11 = arith.constant -1.000000e+00 : f32
    %26 = vector.broadcast %cst_11 : f32 to vector<4x128xf32>
    %27 = arith.cmpf oeq, %12, %26 : vector<4x128xf32>
    %28 = arith.extui %27 : vector<4x128xi1> to vector<4x128xi32>
    %29 = arith.sitofp %28 : vector<4x128xi32> to vector<4x128xf32>
    %cst_12 = arith.constant 1.000000e+00 : f32
    %30 = vector.broadcast %cst_12 : f32 to vector<4x128xf32>
    %31 = arith.addf %30, %12 : vector<4x128xf32>
    %cst_13 = arith.constant 5.000000e-01 : f32
    %32 = vector.broadcast %cst_13 : f32 to vector<4x128xf32>
    %33 = arith.mulf %31, %32 : vector<4x128xf32>
    %34 = arith.mulf %33, %17 : vector<4x128xf32>
    %35 = arith.mulf %34, %17 : vector<4x128xf32>
    %cst_14 = arith.constant 1.000000e+00 : f32
    %36 = vector.broadcast %cst_14 : f32 to vector<4x128xf32>
    %37 = arith.subf %36, %12 : vector<4x128xf32>
    %cst_15 = arith.constant 5.000000e-01 : f32
    %38 = vector.broadcast %cst_15 : f32 to vector<4x128xf32>
    %39 = arith.mulf %37, %38 : vector<4x128xf32>
    %40 = arith.mulf %39, %21 : vector<4x128xf32>
    %41 = arith.mulf %40, %21 : vector<4x128xf32>
    %42 = arith.mulf %3, %12 : vector<4x128xf32>
    %c0_16 = arith.constant 0 : index
    %c0_17 = arith.constant 0 : index
    %43 = vector.load %arg5[%c0_16, %c0_17] : memref<1x1xf32, #tpu.memory_space<vmem>>, vector<1x1xf32>
    %44 = vector.shape_cast %35 : vector<4x128xf32> to vector<1x4x128xf32>
    %cst_18 = arith.constant dense<0.000000e+00> : vector<1xf32>
    %45 = vector.multi_reduction <add>, %44, %cst_18 [1, 2] : vector<1x4x128xf32> to vector<1xf32>
    %46 = vector.shape_cast %45 : vector<1xf32> to vector<1x1x1xf32>
    %47 = vector.extract %46[0, 0, 0] : f32 from vector<1x1x1xf32>
    %48 = vector.broadcast %47 : f32 to vector<1x1xf32>
    %49 = arith.addf %43, %48 : vector<1x1xf32>
    %c0_19 = arith.constant 0 : index
    %c0_20 = arith.constant 0 : index
    %50 = vector.load %arg5[%c0_19, %c0_20] : memref<1x1xf32, #tpu.memory_space<vmem>>, vector<1x1xf32>
    tpu.vector_store %arg5[%c0_19, %c0_20], %49 {strides = array<i32>} : memref<1x1xf32, #tpu.memory_space<vmem>>, vector<1x1xf32>,
    %c0_21 = arith.constant 0 : index
    %c0_22 = arith.constant 0 : index
    %51 = vector.load %arg6[%c0_21, %c0_22] : memref<1x1xf32, #tpu.memory_space<vmem>>, vector<1x1xf32>
    %52 = vector.shape_cast %41 : vector<4x128xf32> to vector<1x4x128xf32>
    %cst_23 = arith.constant dense<0.000000e+00> : vector<1xf32>
    %53 = vector.multi_reduction <add>, %52, %cst_23 [1, 2] : vector<1x4x128xf32> to vector<1xf32>
    %54 = vector.shape_cast %53 : vector<1xf32> to vector<1x1x1xf32>
    %55 = vector.extract %54[0, 0, 0] : f32 from vector<1x1x1xf32>
    %56 = vector.broadcast %55 : f32 to vector<1x1xf32>
    %57 = arith.addf %51, %56 : vector<1x1xf32>
    %c0_24 = arith.constant 0 : index
    %c0_25 = arith.constant 0 : index
    %58 = vector.load %arg6[%c0_24, %c0_25] : memref<1x1xf32, #tpu.memory_space<vmem>>, vector<1x1xf32>
    tpu.vector_store %arg6[%c0_24, %c0_25], %57 {strides = array<i32>} : memref<1x1xf32, #tpu.memory_space<vmem>>, vector<1x1xf32>,
    %c0_26 = arith.constant 0 : index
    %c0_27 = arith.constant 0 : index
    %59 = vector.load %arg7[%c0_26, %c0_27] : memref<1x1xf32, #tpu.memory_space<vmem>>, vector<1x1xf32>
    %60 = vector.shape_cast %25 : vector<4x128xf32> to vector<1x4x128xf32>
    %cst_28 = arith.constant dense<0.000000e+00> : vector<1xf32>
    %61 = vector.multi_reduction <add>, %60, %cst_28 [1, 2] : vector<1x4x128xf32> to vector<1xf32>
    %62 = vector.shape_cast %61 : vector<1xf32> to vector<1x1x1xf32>
    %63 = vector.extract %62[0, 0, 0] : f32 from vector<1x1x1xf32>
    %64 = vector.broadcast %63 : f32 to vector<1x1xf32>
    %65 = arith.addf %59, %64 : vector<1x1xf32>
    %c0_29 = arith.constant 0 : index
    %c0_30 = arith.constant 0 : index
    %66 = vector.load %arg7[%c0_29, %c0_30] : memref<1x1xf32, #tpu.memory_space<vmem>>, vector<1x1xf32>
    tpu.vector_store %arg7[%c0_29, %c0_30], %65 {strides = array<i32>} : memref<1x1xf32, #tpu.memory_space<vmem>>, vector<1x1xf32>,
    %c0_31 = arith.constant 0 : index
    %c0_32 = arith.constant 0 : index
    %67 = vector.load %arg8[%c0_31, %c0_32] : memref<1x1xf32, #tpu.memory_space<vmem>>, vector<1x1xf32>
    %68 = vector.shape_cast %29 : vector<4x128xf32> to vector<1x4x128xf32>
    %cst_33 = arith.constant dense<0.000000e+00> : vector<1xf32>
    %69 = vector.multi_reduction <add>, %68, %cst_33 [1, 2] : vector<1x4x128xf32> to vector<1xf32>
    %70 = vector.shape_cast %69 : vector<1xf32> to vector<1x1x1xf32>
    %71 = vector.extract %70[0, 0, 0] : f32 from vector<1x1x1xf32>
    %72 = vector.broadcast %71 : f32 to vector<1x1xf32>
    %73 = arith.addf %67, %72 : vector<1x1xf32>
    %c0_34 = arith.constant 0 : index
    %c0_35 = arith.constant 0 : index
    %74 = vector.load %arg8[%c0_34, %c0_35] : memref<1x1xf32, #tpu.memory_space<vmem>>, vector<1x1xf32>
    tpu.vector_store %arg8[%c0_34, %c0_35], %73 {strides = array<i32>} : memref<1x1xf32, #tpu.memory_space<vmem>>, vector<1x1xf32>,
    %c0_36 = arith.constant 0 : index
    %c0_37 = arith.constant 0 : index
    %75 = vector.load %arg9[%c0_36, %c0_37] : memref<1x1xf32, #tpu.memory_space<vmem>>, vector<1x1xf32>
    %76 = vector.shape_cast %3 : vector<4x128xf32> to vector<1x4x128xf32>
    %cst_38 = arith.constant dense<0.000000e+00> : vector<1xf32>
    %77 = vector.multi_reduction <add>, %76, %cst_38 [1, 2] : vector<1x4x128xf32> to vector<1xf32>
    %78 = vector.shape_cast %77 : vector<1xf32> to vector<1x1x1xf32>
    %79 = vector.extract %78[0, 0, 0] : f32 from vector<1x1x1xf32>
    %80 = vector.broadcast %79 : f32 to vector<1x1xf32>
    %81 = arith.addf %75, %80 : vector<1x1xf32>
    %c0_39 = arith.constant 0 : index
    %c0_40 = arith.constant 0 : index
    %82 = vector.load %arg9[%c0_39, %c0_40] : memref<1x1xf32, #tpu.memory_space<vmem>>, vector<1x1xf32>
    tpu.vector_store %arg9[%c0_39, %c0_40], %81 {strides = array<i32>} : memref<1x1xf32, #tpu.memory_space<vmem>>, vector<1x1xf32>,
    %c0_41 = arith.constant 0 : index
    %c0_42 = arith.constant 0 : index
    %83 = vector.load %arg10[%c0_41, %c0_42] : memref<1x1xf32, #tpu.memory_space<vmem>>, vector<1x1xf32>
    %84 = vector.shape_cast %12 : vector<4x128xf32> to vector<1x4x128xf32>
    %cst_43 = arith.constant dense<0.000000e+00> : vector<1xf32>
    %85 = vector.multi_reduction <add>, %84, %cst_43 [1, 2] : vector<1x4x128xf32> to vector<1xf32>
    %86 = vector.shape_cast %85 : vector<1xf32> to vector<1x1x1xf32>
    %87 = vector.extract %86[0, 0, 0] : f32 from vector<1x1x1xf32>
    %88 = vector.broadcast %87 : f32 to vector<1x1xf32>
    %89 = arith.addf %83, %88 : vector<1x1xf32>
    %c0_44 = arith.constant 0 : index
    %c0_45 = arith.constant 0 : index
    %90 = vector.load %arg10[%c0_44, %c0_45] : memref<1x1xf32, #tpu.memory_space<vmem>>, vector<1x1xf32>
    tpu.vector_store %arg10[%c0_44, %c0_45], %89 {strides = array<i32>} : memref<1x1xf32, #tpu.memory_space<vmem>>, vector<1x1xf32>,
    %c0_46 = arith.constant 0 : index
    %c0_47 = arith.constant 0 : index
    %91 = vector.load %arg11[%c0_46, %c0_47] : memref<1x1xf32, #tpu.memory_space<vmem>>, vector<1x1xf32>
    %92 = vector.shape_cast %42 : vector<4x128xf32> to vector<1x4x128xf32>
    %cst_48 = arith.constant dense<0.000000e+00> : vector<1xf32>
    %93 = vector.multi_reduction <add>, %92, %cst_48 [1, 2] : vector<1x4x128xf32> to vector<1xf32>
    %94 = vector.shape_cast %93 : vector<1xf32> to vector<1x1x1xf32>
    %95 = vector.extract %94[0, 0, 0] : f32 from vector<1x1x1xf32>
    %96 = vector.broadcast %95 : f32 to vector<1x1xf32>
    %97 = arith.addf %91, %96 : vector<1x1xf32>
    %c0_49 = arith.constant 0 : index
    %c0_50 = arith.constant 0 : index
    %98 = vector.load %arg11[%c0_49, %c0_50] : memref<1x1xf32, #tpu.memory_space<vmem>>, vector<1x1xf32>
    tpu.vector_store %arg11[%c0_49, %c0_50], %97 {strides = array<i32>} : memref<1x1xf32, #tpu.memory_space<vmem>>, vector<1x1xf32>,
    %c0_i32_51 = arith.constant 0 : i32
    %99 = arith.cmpi eq, %arg0, %c0_i32_51 : i32
    %100 = arith.extui %99 : i1 to i32
    %c0_i32_52 = arith.constant 0 : i32
    %101 = arith.cmpi ne, %100, %c0_i32_52 : i32
    scf.if %101 {
      %c0_53 = arith.constant 0 : index
      %c0_54 = arith.constant 0 : index
      %102 = vector.load %arg7[%c0_53, %c0_54] : memref<1x1xf32, #tpu.memory_space<vmem>>, vector<1x1xf32>
      %cst_55 = arith.constant 9.99999974E-5 : f32
      %103 = vector.broadcast %cst_55 : f32 to vector<1x1xf32>
      %104 = arith.addf %102, %103 : vector<1x1xf32>
      %c0_56 = arith.constant 0 : index
      %c0_57 = arith.constant 0 : index
      %105 = vector.load %arg8[%c0_56, %c0_57] : memref<1x1xf32, #tpu.memory_space<vmem>>, vector<1x1xf32>
      %cst_58 = arith.constant 9.99999974E-5 : f32
      %106 = vector.broadcast %cst_58 : f32 to vector<1x1xf32>
      %107 = arith.addf %105, %106 : vector<1x1xf32>
      %c0_59 = arith.constant 0 : index
      %c0_60 = arith.constant 0 : index
      %108 = vector.load %arg5[%c0_59, %c0_60] : memref<1x1xf32, #tpu.memory_space<vmem>>, vector<1x1xf32>
      %109 = arith.divf %108, %104 : vector<1x1xf32>
      %c0_61 = arith.constant 0 : index
      %c0_62 = arith.constant 0 : index
      %110 = vector.load %arg6[%c0_61, %c0_62] : memref<1x1xf32, #tpu.memory_space<vmem>>, vector<1x1xf32>
      %111 = arith.divf %110, %107 : vector<1x1xf32>
      %112 = arith.addf %109, %111 : vector<1x1xf32>
      %c0_63 = arith.constant 0 : index
      %c0_64 = arith.constant 0 : index
      %113 = vector.load %arg3[%c0_63, %c0_64] : memref<1x1xf32, #tpu.memory_space<vmem>>, vector<1x1xf32>
      tpu.vector_store %arg3[%c0_63, %c0_64], %112 {strides = array<i32>} : memref<1x1xf32, #tpu.memory_space<vmem>>, vector<1x1xf32>,
      %c0_65 = arith.constant 0 : index
      %c0_66 = arith.constant 0 : index
      %114 = vector.load %arg9[%c0_65, %c0_66] : memref<1x1xf32, #tpu.memory_space<vmem>>, vector<1x1xf32>
      %c0_67 = arith.constant 0 : index
      %c0_68 = arith.constant 0 : index
      %115 = vector.load %arg10[%c0_67, %c0_68] : memref<1x1xf32, #tpu.memory_space<vmem>>, vector<1x1xf32>
      %116 = arith.addf %114, %115 : vector<1x1xf32>
      %cst_69 = arith.constant 9.99999974E-6 : f32
      %117 = vector.broadcast %cst_69 : f32 to vector<1x1xf32>
      %118 = arith.addf %116, %117 : vector<1x1xf32>
      %c0_70 = arith.constant 0 : index
      %c0_71 = arith.constant 0 : index
      %119 = vector.load %arg11[%c0_70, %c0_71] : memref<1x1xf32, #tpu.memory_space<vmem>>, vector<1x1xf32>
      %cst_72 = arith.constant 2.000000e+00 : f32
      %120 = vector.broadcast %cst_72 : f32 to vector<1x1xf32>
      %121 = arith.mulf %120, %119 : vector<1x1xf32>
      %cst_73 = arith.constant 9.99999974E-6 : f32
      %122 = vector.broadcast %cst_73 : f32 to vector<1x1xf32>
      %123 = arith.addf %121, %122 : vector<1x1xf32>
      %124 = arith.divf %123, %118 : vector<1x1xf32>
      %cst_74 = arith.constant 1.000000e+00 : f32
      %125 = vector.broadcast %cst_74 : f32 to vector<1x1xf32>
      %126 = arith.subf %125, %124 : vector<1x1xf32>
      %c0_75 = arith.constant 0 : index
      %c0_76 = arith.constant 0 : index
      %127 = vector.load %arg4[%c0_75, %c0_76] : memref<1x1xf32, #tpu.memory_space<vmem>>, vector<1x1xf32>
      tpu.vector_store %arg4[%c0_75, %c0_76], %126 {strides = array<i32>} : memref<1x1xf32, #tpu.memory_space<vmem>>, vector<1x1xf32>,
    } else {
    }
    return
  }
  func.func @transform_0(%arg0: i32) -> (i32, i32) {
    %c0_i32 = arith.constant 0 : i32
    %c0_i32_0 = arith.constant 0 : i32
    return %arg0, %c0_i32 : i32, i32
  }
  func.func @transform_1(%arg0: i32) -> (i32, i32) {
    %c0_i32 = arith.constant 0 : i32
    %c0_i32_0 = arith.constant 0 : i32
    return %arg0, %c0_i32 : i32, i32
  }
  func.func @transform_2(%arg0: i32) -> (i32, i32) {
    %c0_i32 = arith.constant 0 : i32
    %c0_i32_0 = arith.constant 0 : i32
    %c0_i32_1 = arith.constant 0 : i32
    return %c0_i32, %c0_i32_0 : i32, i32
  }
  func.func @transform_3(%arg0: i32) -> (i32, i32) {
    %c0_i32 = arith.constant 0 : i32
    %c0_i32_0 = arith.constant 0 : i32
    %c0_i32_1 = arith.constant 0 : i32
    return %c0_i32, %c0_i32_0 : i32, i32
  }
}

</mosaic_0001>

<bundles_post_ra>
// kernel: tpu_custom_call.1
= control target key start
LH: loop header
LB: loop body
LE: loop exit
PB: predicated region body
PF: predicated region fallthrough
CT: control target
= control target key end

     0   :  { %9 = vsyncpa [#allocation10], 0  ;;  %s410_s0 = inlined_call_operand.hbm [shape: f32[4,128], index: 0, kind: input, shape index: {}]   ;;  %s411_s1 = inlined_call_operand.hbm [shape: f32[4,128], index: 1, kind: input, shape index: {}]   ;;  %s412_s2 = inlined_call_operand.hbm [shape: f32[1,1], index: 2, kind: output, shape index: {0}]   ;;  %s413_s3 = inlined_call_operand.hbm [shape: f32[1,1], index: 3, kind: output, shape index: {1}]  }
   0x1   :  { %10 = vsyncpa [#allocation13], 0 }
   0x2   :  { %11 = vsyncpa [#allocation11], 0 }
   0x3   :  { %12 = vsyncpa [#allocation16], 0  ;;  %s350_s12 = smov [#allocation9]   ;;  %s351_s14 = smov [#allocation12]  }
   0x4   :  { %s19_s13 = sshll.u32 %s350_s12, 4  ;;  %s29_s15 = sshll.u32 %s351_s14, 4  ;;  %s20_s13 = int_to_ptr.vmem [resolvable:$true] %s19_s13  ;;  %s30_s15 = int_to_ptr.vmem [resolvable:$true] %s29_s15 }
   0x5   :  { %s270_s16 = scalar_lea.vmem %s20_s13, 64  ;;  %p275_p1 = scmp.lt.s32.totalorder %s20_s13, %s20_s13 }
   0x6   :  { %p271_p0 = scmp.ne.s32.totalorder %s20_s13, %s270_s16  ;;  %p276_p2 = scmp.lt.s32.totalorder %s270_s16, %s270_s16 }
   0x8   :  { %p277_p3 = por %p276_p2, %p275_p1 }
   0xa   :  { %p278_p4 = pnand %p277_p3, %p271_p0 }
   0xc   :  { %281 = shalt.err (!%p278_p4)
}
   0xd   :  { %22 = dma.hbm_to_vmem [thread:$0]  %s410_s0, 64, %s20_s13, [#allocation10]  }
   0xe   :  { %s290_s19 = scalar_lea.vmem %s30_s15, 64  ;;  %p295_p6 = scmp.lt.s32.totalorder %s30_s15, %s30_s15 }
   0xf   :  { %p291_p5 = scmp.ne.s32.totalorder %s30_s15, %s290_s19  ;;  %p296_p7 = scmp.lt.s32.totalorder %s290_s19, %s290_s19 }
  0x11   :  { %p297_p8 = por %p296_p7, %p295_p6 }
  0x13   :  { %p298_p9 = pnand %p297_p8, %p291_p5 }
  0x15   :  { %301 = shalt.err (!%p298_p9)
}
  0x16   :  { %32 = dma.hbm_to_vmem [thread:$0]  %s411_s1, 64, %s30_s15, [#allocation13]  }
  0x17   :  { %342 = dma.done.wait [#allocation10], 64  }
  0x18   :  { %343 = vsyncadd [#allocation10], 4294967232 }
  0x19   :  { %344 = dma.done.wait [#allocation13], 64  }
  0x1a   :  { %345 = vsyncadd [#allocation13], 4294967232  ;;  %v52_v0 = vld [vmem:[#allocation12] sm:$0xf]  ;;  %vm79_vm2 = vcmask 1043456   ;;  %v352_v5 = vmov 0.0  }
  0x1b   :  { %vm53_vm0 = vcmp.eq.f32.partialorder %v52_v0, 1.0  ;;  %vm54_vm1 = vcmp.eq.f32.partialorder %v52_v0, 0.0  ;;  %v51_v3 = vld [vmem:[#allocation9] sm:$0xf]  ;;  %vm43_vm6 = vcmask 0   ;;  %s353_s27 = smov [#allocation14]  }
  0x1c   :  { %v55_v1 = vsel %vm54_vm1, 1.0, %v52_v0  ;;  %v137_v24 = vsel %vm79_vm2, %v51_v3, 0.0  ;;  %44 = vst.msk [vmem:[#allocation2] sm:$0x1] %vm43_vm6, %v352_v5  ;;  %45 = vst.msk [vmem:[#allocation3] sm:$0x1] %vm43_vm6, %v352_v5 }
  0x1d   :  { %v56_v2 = vsel %vm53_vm0, -1.0, %v55_v1  ;;  %46 = vst.msk [vmem:[#allocation4] sm:$0x1] %vm43_vm6, %v352_v5  ;;  %47 = vst.msk [vmem:[#allocation5] sm:$0x1] %vm43_vm6, %v352_v5  ;;  %s210_s28 = sshll.u32 %s353_s27, 4  ;;  %s211_s28 = int_to_ptr.vmem [resolvable:$true] %s210_s28 }
  0x1e   :  { %vm63_vm3 = vcmp.eq.f32.partialorder %v56_v2, 1.0  ;;  %vm66_vm4 = vcmp.eq.f32.partialorder %v56_v2, -1.0  ;;  %vm57_vm5 = vcmp.ne.f32.partialorder %v56_v2, 255.0  ;;  %v69_v4 = vadd.f32 1.0, %v56_v2  ;;  %48 = vst.msk [vmem:[#allocation6] sm:$0x1] %vm43_vm6, %v352_v5  ;;  %p307_p11 = scmp.lt.s32.totalorder %s211_s28, %s211_s28 }
  0x1f   :  { %v235_v6 = vsel %vm63_vm3, 1.0, %v352_v5  ;;  %v236_v7 = vsel %vm66_vm4, 1.0, %v352_v5  ;;  %v234_v8 = vsel %vm57_vm5, 1.0, %v352_v5  ;;  %v73_v12 = vsub.f32 1.0, %v56_v2  ;;  %49 = vst.msk [vmem:[#allocation7] sm:$0x1] %vm43_vm6, %v352_v5 }
  0x20   :  { %v109_v9 = vsel %vm79_vm2, %v235_v6, 0.0  ;;  %v60_v10 = vmul.f32 %v234_v8, %v51_v3  ;;  %v70_v11 = vmul.f32 0.5, %v69_v4  ;;  %v123_v13 = vsel %vm79_vm2, %v236_v7, 0.0  ;;  %50 = vst.msk [vmem:[#allocation8] sm:$0x1] %vm43_vm6, %v352_v5  ;;  %s354_s29 = smov [#allocation15]  }
  0x21   :  { %110 = vadd.xlane.f32.xlu1 %v109_v9  ;;  %v74_v16 = vmul.f32 0.5, %v73_v12  ;;  %v151_v20 = vsel %vm79_vm2, %v56_v2, 0.0  ;;  %v77_v25 = vmul.f32 %v56_v2, %v51_v3  ;;  %s220_s30 = sshll.u32 %s354_s29, 4  ;;  %s302_s4 = scalar_lea.vmem %s211_s28, 16  ;;  %s221_s30 = int_to_ptr.vmem [resolvable:$true] %s220_s30 }
  0x22   :  { %v71_v14 = vmul.f32 %v70_v11, %v60_v10  ;;  %v61_v15 = vsub.f32 2.0, %v60_v10  ;;  %p303_p10 = scmp.ne.s32.totalorder %s211_s28, %s302_s4  ;;  %s306_s5 = scalar_lea.vmem %s211_s28, 32 }
  0x23   :  { %v165_v26 = vsel %vm79_vm2, %v77_v25, 0.0  ;;  %v78_v12 = vld [vmem:[#allocation2] sm:$0x1]  ;;  %p308_p12 = scmp.lt.s32.totalorder %s306_s5, %s302_s4 }
  0x24   :  { %v72_v17 = vmul.f32 %v71_v14, %v60_v10  ;;  %v62_v18 = vmax.f32 %v61_v15, 0.0  ;;  %v94_v15 = vld [vmem:[#allocation3] sm:$0x1] }
  0x25   :  { %124 = vadd.xlane.f32.xlu1 %v123_v13  ;;  %p309_p13 = por %p308_p12, %p307_p11 }
  0x26   :  { %v80_v19 = vsel %vm79_vm2, %v72_v17, 0.0  ;;  %v75_v21 = vmul.f32 %v74_v16, %v62_v18  ;;  %v108_v16 = vld [vmem:[#allocation4] sm:$0x1]  ;;  %v150_v25 = vld [vmem:[#allocation7] sm:$0x1] }
  0x27   :  { %81 = vadd.xlane.f32.xlu0 %v80_v19  ;;  %p310_p0 = pnand %p309_p13, %p303_p10 }
  0x28   :  { %v76_v22 = vmul.f32 %v75_v21, %v62_v18  ;;  %v122_v18 = vld [vmem:[#allocation5] sm:$0x1] }
  0x29   :  { %152 = vadd.xlane.f32.xlu1 %v151_v20 }
  0x2a   :  { %v95_v23 = vsel %vm79_vm2, %v76_v22, 0.0 }
  0x2b   :  { %96 = vadd.xlane.f32.xlu0 %v95_v23  ;;  %v136_v23 = vld [vmem:[#allocation6] sm:$0x1] }
  0x2f   :  { %138 = vadd.xlane.f32.xlu0 %v137_v24 }
  0x33   :  { %166 = vadd.xlane.f32.xlu0 %v165_v26 }
  0xaa   :  { %v111_v27 = vpop.xlane.xlu1 %110 }
  0xab   :  { %v112_v28 = vrot.slane %v111_v27, 4 }
  0xad   :  { %v113_v31 = vadd.f32 %v112_v28, %v111_v27 }
  0xae   :  { %v125_v29 = vpop.xlane.xlu1 %124 }
  0xaf   :  { %v126_v30 = vrot.slane %v125_v29, 4  ;;  %v114_v38 = vrot.slane %v113_v31, 2 }
  0xb0   :  { %v82_v32 = vpop.xlane.xlu0 %81 }
  0xb1   :  { %v127_v33 = vadd.f32 %v126_v30, %v125_v29  ;;  %v83_v34 = vrot.slane %v82_v32, 4  ;;  %v115_v48 = vadd.f32 %v114_v38, %v113_v31  ;;  %v164_v30 = vld [vmem:[#allocation8] sm:$0x1] }
  0xb2   :  { %v153_v35 = vpop.xlane.xlu1 %152 }
  0xb3   :  { %v84_v36 = vadd.f32 %v83_v34, %v82_v32  ;;  %v154_v37 = vrot.slane %v153_v35, 4  ;;  %v128_v40 = vrot.slane %v127_v33, 2  ;;  %v116_v58 = vrot.slane %v115_v48, 1 }
  0xb4   :  { %v97_v39 = vpop.xlane.xlu0 %96 }
  0xb5   :  { %v85_v41 = vrot.slane %v84_v36, 2  ;;  %v155_v42 = vadd.f32 %v154_v37, %v153_v35  ;;  %v98_v43 = vrot.slane %v97_v39, 4  ;;  %v129_v52 = vadd.f32 %v128_v40, %v127_v33 }
  0xb6   :  { %v117_v2 = vadd.f32 %v116_v58, %v115_v48 }
  0xb7   :  { %v99_v44 = vadd.f32 %v98_v43, %v97_v39  ;;  %v86_v45 = vadd.f32 %v85_v41, %v84_v36  ;;  %v156_v46 = vrot.slane %v155_v42, 2  ;;  %v130_v62 = vrot.slane %v129_v52, 1 }
  0xb8   :  { %v139_v47 = vpop.xlane.xlu0 %138 }
  0xb9   :  { %v100_v49 = vrot.slane %v99_v44, 2  ;;  %v140_v50 = vrot.slane %v139_v47, 4  ;;  %v87_v51 = vrot.slane %v86_v45, 1  ;;  %v157_v56 = vadd.f32 %v156_v46, %v155_v42 }
  0xba   :  { %v131_v5 = vadd.f32 %v130_v62, %v129_v52 }
  0xbb   :  { %v141_v53 = vadd.f32 %v140_v50, %v139_v47  ;;  %v88_v54 = vadd.f32 %v87_v51, %v86_v45  ;;  %v101_v55 = vadd.f32 %v100_v49, %v99_v44  ;;  %v158_v3 = vrot.slane %v157_v56, 1 }
  0xbc   :  { %v167_v57 = vpop.xlane.xlu0 %166 }
  0xbd   :  { %v142_v59 = vrot.slane %v141_v53, 2  ;;  %237 = vpush %v88_v54  ;;  %v168_v60 = vrot.slane %v167_v57, 4  ;;  %v102_v61 = vrot.slane %v101_v55, 1  ;;  %v159_v9 = vadd.f32 %v158_v3, %v157_v56 }
  0xbf   :  { %v169_v63 = vadd.f32 %v168_v60, %v167_v57  ;;  %v103_v0 = vadd.f32 %v102_v61, %v101_v55  ;;  %v143_v1 = vadd.f32 %v142_v59, %v141_v53 }
  0xc1   :  { %v170_v4 = vrot.slane %v169_v63, 2  ;;  %239 = vpush %v103_v0  ;;  %v144_v6 = vrot.slane %v143_v1, 1 }
  0xc2   :  { %241 = vpush %v117_v2 }
  0xc3   :  { %v171_v7 = vadd.f32 %v170_v4, %v169_v63  ;;  %243 = vpush %v131_v5  ;;  %v145_v8 = vadd.f32 %v144_v6, %v143_v1 }
  0xc5   :  { %245 = vpush %v145_v8  ;;  %v172_v10 = vrot.slane %v171_v7, 1 }
  0xc6   :  { %247 = vpush %v159_v9 }
  0xc7   :  { %v173_v11 = vadd.f32 %v172_v10, %v171_v7 }
  0xc9   :  { %249 = vpush %v173_v11 }
  0xee   :  { %s238_s0 = spop %237 }
  0xef   :  { %v90_v13 = vstv %s238_s0 }
  0xf0   :  { %v91_v14 = vadd.f32 %v90_v13, %v78_v12 }
  0xf2   :  { %93 = vst.msk [vmem:[#allocation2] sm:$0x1] %vm43_vm6, %v91_v14  ;;  %s240_s1 = spop %239 }
  0xf3   :  { %v105_v17 = vstv %s240_s1  ;;  %s242_s22 = spop %241 }
  0xf4   :  { %v106_v19 = vadd.f32 %v105_v17, %v94_v15  ;;  %v119_v20 = vstv %s242_s22  ;;  %s244_s23 = spop %243 }
  0xf5   :  { %v120_v21 = vadd.f32 %v119_v20, %v108_v16  ;;  %v133_v22 = vstv %s244_s23 }
  0xf6   :  { %107 = vst.msk [vmem:[#allocation3] sm:$0x1] %vm43_vm6, %v106_v19  ;;  %v134_v24 = vadd.f32 %v133_v22, %v122_v18  ;;  %s246_s24 = spop %245 }
  0xf7   :  { %121 = vst.msk [vmem:[#allocation4] sm:$0x1] %vm43_vm6, %v120_v21  ;;  %v147_v26 = vstv %s246_s24  ;;  %s248_s25 = spop %247 }
  0xf8   :  { %135 = vst.msk [vmem:[#allocation5] sm:$0x1] %vm43_vm6, %v134_v24  ;;  %v148_v27 = vadd.f32 %v147_v26, %v136_v23  ;;  %v161_v28 = vstv %s248_s25 }
  0xf9   :  { %v162_v29 = vadd.f32 %v161_v28, %v150_v25  ;;  %v185_v43 = vld [vmem:[#allocation2] sm:$0x1] }
  0xfa   :  { %149 = vst.msk [vmem:[#allocation6] sm:$0x1] %vm43_vm6, %v148_v27  ;;  %s250_s26 = spop %249 }
  0xfb   :  { %163 = vst.msk [vmem:[#allocation7] sm:$0x1] %vm43_vm6, %v162_v29  ;;  %v175_v31 = vstv %s250_s26 }
  0xfc   :  { %v176_v32 = vadd.f32 %v175_v31, %v164_v30 }
  0xfd   :  { %v188_v46 = vld [vmem:[#allocation3] sm:$0x1] }
  0xfe   :  { %177 = vst.msk [vmem:[#allocation8] sm:$0x1] %vm43_vm6, %v176_v32  ;;  %v181_v33 = vld [vmem:[#allocation4] sm:$0x1] }
  0xff   :  { %v182_v34 = vadd.f32 0.0001, %v181_v33  ;;  %v183_v35 = vld [vmem:[#allocation5] sm:$0x1] }
 0x100   :  { %v184_v36 = vadd.f32 0.0001, %v183_v35 }
 0x101   :  { %256 = vrcp.f32 %v182_v34  ;;  %v193_v37 = vld [vmem:[#allocation6] sm:$0x1] }
 0x102   :  { %258 = vrcp.f32 %v184_v36  ;;  %v194_v38 = vld [vmem:[#allocation7] sm:$0x1] }
 0x103   :  { %v195_v39 = vadd.f32 %v194_v38, %v193_v37 }
 0x105   :  { %v196_v40 = vadd.f32 1e-05, %v195_v39  ;;  %v197_v41 = vld [vmem:[#allocation8] sm:$0x1] }
 0x106   :  { %v198_v47 = vmul.f32 2.0, %v197_v41 }
 0x107   :  { %260 = vrcp.f32 %v196_v40 }
 0x108   :  { %v199_v50 = vadd.f32 1e-05, %v198_v47 }
 0x10e   :  { %v257_v42 = vpop.eup %256 }
 0x10f   :  { %v259_v44 = vpop.eup %258  ;;  %v187_v45 = vmul.f32 %v257_v42, %v185_v43 }
 0x110   :  { %v190_v48 = vmul.f32 %v259_v44, %v188_v46 }
 0x112   :  { %v191_v49 = vadd.f32 %v190_v48, %v187_v45 }
 0x114   :  { %v261_v51 = vpop.eup %260  ;;  %192 = vst.msk [vmem:[#allocation14] sm:$0x1] %vm43_vm6, %v191_v49 }
 0x115   :  { %313 = shalt.err (!%p310_p0)
}
 0x116   :  { %213 = dma.vmem_to_hbm [thread:$0]  %s211_s28, 16, %s412_s2, [#allocation11]   ;;  %v201_v52 = vmul.f32 %v261_v51, %v199_v50 }
 0x117   :  { %s322_s8 = scalar_lea.vmem %s221_s30, 16  ;;  %s326_s9 = scalar_lea.vmem %s221_s30, 32 }
 0x118   :  { %v202_v53 = vsub.f32 1.0, %v201_v52  ;;  %p323_p1 = scmp.ne.s32.totalorder %s221_s30, %s322_s8  ;;  %p327_p2 = scmp.lt.s32.totalorder %s221_s30, %s221_s30 }
 0x119   :  { %p328_p3 = scmp.lt.s32.totalorder %s326_s9, %s322_s8 }
 0x11a   :  { %203 = vst.msk [vmem:[#allocation15] sm:$0x1] %vm43_vm6, %v202_v53 }
 0x11b   :  { %p329_p4 = por %p328_p3, %p327_p2 }
 0x11d   :  { %p330_p5 = pnand %p329_p4, %p323_p1 }
 0x11f   :  { %333 = shalt.err (!%p330_p5)
}
 0x120   :  { %223 = dma.vmem_to_hbm [thread:$0]  %s221_s30, 16, %s413_s3, [#allocation16]  }
 0x121   :  { %346 = dma.done.wait [#allocation11], 16  }
 0x122   :  { %347 = vsyncadd [#allocation11], 4294967280 }
 0x123   :  { %348 = dma.done.wait [#allocation16], 16  }
 0x124   :  { %349 = vsyncadd [#allocation16], 4294967280 }
 0x125   :  { %230 = vsyncpa [#allocation10], 1 }
 0x126   :  { %231 = vsyncpa [#allocation13], 1 }
 0x127   :  { %232 = vsyncpa [#allocation11], 1 }
 0x128   :  { %233 = vsyncpa [#allocation16], 1 }

</bundles_post_ra>
